<compile_context>
chip_gen: v7x
topology: tpu7x:2x2x1
jax: 0.10.0
libtpu: 0.0.40
codegen_flags: <defaults>
</compile_context>

<pallas_src>
import jax
import jax.numpy as jnp
from jax.experimental import pallas as pl
from jax.experimental.pallas import tpu as pltpu

_LANE = 128


def _round_up(x, m):
    return (x + m - 1) // m * m


def _cdiv(a, b):
    return -(-a // b)


def _sublane(dtype):
    # Minimum sublane multiple: 8 for 32-bit, 16 for bf16/fp16, 32 for 8-bit dtypes.
    return max(8, 32 // jnp.dtype(dtype).itemsize)


def _vmem_capacity_bytes():
    try:
        info = pltpu.get_tpu_info()
        cap = getattr(info, "vmem_capacity_bytes", None)
        if cap:
            return int(cap)
    except Exception:
        pass
    return 64 * 1024 * 1024   # v7x-safe fallback (smallest VMEM of supported gens)


# ------------------------------------------------------------------ kernels --

def _linear_bias_kernel(x_ref, w_ref, b_ref, o_ref):
    """Canonical contraction: x [*, K] @ w [K, N] + b [1, N] -> o [*, N].

    Used both grid-less (whole padded problem in VMEM) and on a 2-D (M, N)
    grid when the K axis collapses (tk == Cp): single MXU pass, fused bias
    epilogue, no accumulator scratch.
    """
    acc = jnp.dot(x_ref[...], w_ref[...], preferred_element_type=jnp.float32)
    o_ref[...] = (acc + b_ref[...].astype(jnp.float32)).astype(o_ref.dtype)


def _linear_bias_acc_kernel(x_ref, w_ref, b_ref, o_ref, acc_ref):
    """(M, N, K)-tiled path with f32 VMEM accumulator; K is grid axis 2.

    The k==0 bias-init is merged with the first partial product (one write,
    no separate broadcast + read-modify-write).
    """
    k = pl.program_id(2)
    partial = jnp.dot(x_ref[...], w_ref[...], preferred_element_type=jnp.float32)

    @pl.when(k == 0)
    def _init_with_first_accum():
        acc_ref[...] = partial + b_ref[...].astype(jnp.float32)

    @pl.when(k > 0)
    def _accumulate():
        acc_ref[...] += partial

    @pl.when(k == pl.num_programs(2) - 1)
    def _store():
        o_ref[...] = acc_ref[...].astype(o_ref.dtype)


# ----------------------------------------------------- one-time param packing --

def prepare_forecasting_params(weight, bias, *, compute_dtype=None,
                               max_tm=256, max_tn=1024, max_tk=2048):
    """Pack the static nn.Linear parameters once (at model init).

    weight: [forecast_length, context_dim]  (PyTorch nn.Linear layout)
    bias:   [forecast_length]

    Returns a dict holding the pre-transposed, zero-padded, lane-dense weight
    [Cp, Fp], the padded f32 bias [1, Fp], and the tile plan.  Per-call work
    then only pads the activation, so W is never re-padded / re-laid-out on
    the hot path.
    """
    F_dim, C_dim = weight.shape
    assert bias.shape == (F_dim,)
    if compute_dtype is None:
        compute_dtype = weight.dtype
    itemsize = jnp.dtype(compute_dtype).itemsize
    sub = _sublane(compute_dtype)

    Fp = _round_up(F_dim, _LANE)
    Cp = _round_up(C_dim, _LANE)

    vmem_cap = _vmem_capacity_bytes()
    # Scoped VMEM limit we request from the compiler (leave headroom below physical).
    vmem_limit = min(vmem_cap * 3 // 4, 100 * 1024 * 1024)
    tile_budget = int(vmem_limit * 0.6)   # double-buffered tile footprint budget

    # --- N tile: split F into >= 2 'parallel' blocks when possible so v7x's two
    # TensorCores each stream a disjoint half of W.  M is never split for this:
    # splitting M re-streams every W tile once per M block (2x W HBM traffic).
    if Fp >= 2 * 256:
        tn = min(_round_up(_cdiv(Fp, 2), 256), max_tn, Fp)
    else:
        tn = min(Fp, max_tn)
    # --- K tile: as large as possible; tk == Cp collapses the K grid axis so the
    # revolving accumulator (and its per-step VMEM read/write) disappears.
    tk = min(Cp, max_tk)
    tm = _round_up(min(max_tm, 256), sub)   # worst-case M tile for the budget calc

    def footprint(tm_, tn_, tk_):
        dbl = 2 * (tm_ * tk_ + tk_ * tn_ + tn_ + tm_ * tn_) * itemsize
        acc = tm_ * tn_ * 4 if tk_ < Cp else 0
        return dbl + acc

    while footprint(tm, tn, tk) > tile_budget and tk > 512:
        tk = max(512, tk // 2)
    while footprint(tm, tn, tk) > tile_budget and tn > 256:
        tn = max(256, tn // 2)
    while footprint(tm, tn, tk) > tile_budget and tm > sub:
        tm = max(sub, tm // 2)

    Fp = _round_up(Fp, tn)
    Cp = _round_up(Cp, tk)

    # One-time HBM pass over W (init-time, not per call): transpose to [C, F]
    # so the kernel contraction is canonical, and zero-pad the K/F dims (the
    # zero K padding keeps the contraction exact).
    w_packed = jnp.zeros((Cp, Fp), dtype=compute_dtype)
    w_packed = w_packed.at[:C_dim, :F_dim].set(weight.T.astype(compute_dtype))
    b_packed = jnp.zeros((1, Fp), dtype=jnp.float32)
    b_packed = b_packed.at[0, :F_dim].set(bias.astype(jnp.float32))

    return dict(w=w_packed, b=b_packed, F=F_dim, C=C_dim, Fp=Fp, Cp=Cp,
                tn=tn, tk=tk, max_tm=max_tm, sub=sub,
                compute_dtype=compute_dtype, vmem_limit=int(vmem_limit))


# ------------------------------------------------------------------ wrapper --

def forecasting_layer(context, params, *, force_tiled=False):
    """context: [B, C] -> [B, F]   (== context @ W.T + bias, nn.Linear forward)."""
    B, C = context.shape
    assert C == params["C"], "context last dim must equal context_dim"
    F_dim = params["F"]
    Cp, Fp = params["Cp"], params["Fp"]
    tn, tk = params["tn"], params["tk"]
    sub = params["sub"]
    cdt = params["compute_dtype"]
    w_p, b_p = params["w"], params["b"]
    vmem_limit = params["vmem_limit"]
    itemsize = jnp.dtype(cdt).itemsize
    out_dtype = context.dtype

    Bp = _round_up(B, sub)

    def pad_x(rows):
        x = context.astype(cdt)
        if (rows, Cp) != (B, C):
            x = jnp.pad(x, ((0, rows - B), (0, Cp - C)))
        return x

    # ----------------------- grid-less single-block fast path -----------------
    single_block_bytes = (Bp * Cp + Cp * Fp + Fp + Bp * Fp) * itemsize
    if single_block_bytes <= vmem_limit // 2 and not force_tiled:
        out_p = pl.pallas_call(
            _linear_bias_kernel,
            out_shape=jax.ShapeDtypeStruct((Bp, Fp), out_dtype),
            compiler_params=pltpu.CompilerParams(vmem_limit_bytes=vmem_limit),
        )(pad_x(Bp), w_p, b_p)
        return out_p[:B, :F_dim] if (Bp, Fp) != (B, F_dim) else out_p

    # ------------------------------- tiled path -------------------------------
    tm = min(Bp, _round_up(min(params["max_tm"], 256), sub))
    Bp = _round_up(Bp, tm)
    x_p = pad_x(Bp)

    n_k = Cp // tk
    if n_k == 1:
        # K collapsed: 2-D (M, N) grid, no accumulator, direct fused store.
        grid = (Bp // tm, Fp // tn)
        out_p = pl.pallas_call(
            _linear_bias_kernel,
            out_shape=jax.ShapeDtypeStruct((Bp, Fp), out_dtype),
            grid_spec=pltpu.PrefetchScalarGridSpec(
                num_scalar_prefetch=0,
                grid=grid,
                in_specs=[
                    pl.BlockSpec((tm, tk), lambda i, j: (i, 0)),   # x
                    pl.BlockSpec((tk, tn), lambda i, j: (0, j)),   # w [C, F]
                    pl.BlockSpec((1, tn), lambda i, j: (0, j)),    # bias
                ],
                out_specs=pl.BlockSpec((tm, tn), lambda i, j: (i, j)),
            ),
            compiler_params=pltpu.CompilerParams(
                dimension_semantics=("parallel", "parallel"),
                vmem_limit_bytes=vmem_limit),
        )(x_p, w_p, b_p)
    else:
        # Full (M, N, K) grid with f32 VMEM accumulator; K innermost 'arbitrary'.
        grid = (Bp // tm, Fp // tn, n_k)
        out_p = pl.pallas_call(
            _linear_bias_acc_kernel,
            out_shape=jax.ShapeDtypeStruct((Bp, Fp), out_dtype),
            grid_spec=pltpu.PrefetchScalarGridSpec(
                num_scalar_prefetch=0,
                grid=grid,
                in_specs=[
                    pl.BlockSpec((tm, tk), lambda i, j, k: (i, k)),   # x
                    pl.BlockSpec((tk, tn), lambda i, j, k: (k, j)),   # w [C, F]
                    pl.BlockSpec((1, tn), lambda i, j, k: (0, j)),    # bias
                ],
                out_specs=pl.BlockSpec((tm, tn), lambda i, j, k: (i, j)),
                scratch_shapes=[pltpu.VMEM((tm, tn), jnp.float32)],
            ),
            compiler_params=pltpu.CompilerParams(
                dimension_semantics=("parallel", "parallel", "arbitrary"),
                vmem_limit_bytes=vmem_limit),
        )(x_p, w_p, b_p)

    return out_p[:B, :F_dim] if (Bp, Fp) != (B, F_dim) else out_p


# --------------------------------------------------------------------- test --

if __name__ == "__main__":
    key = jax.random.PRNGKey(0)
    k_x, k_w, k_b = jax.random.split(key, 3)

    # 1) Small shapes implied by the module -> grid-less single-block path.
    batch, context_dim, forecast_length = 8, 32, 16
    context = jax.random.normal(k_x, (batch, context_dim), dtype=jnp.float32)
    bound = 1.0 / (context_dim ** 0.5)            # nn.Linear default init bounds
    weight = jax.random.uniform(k_w, (forecast_length, context_dim),
                                minval=-bound, maxval=bound, dtype=jnp.float32)
    bias = jax.random.uniform(k_b, (forecast_length,),
                              minval=-bound, maxval=bound, dtype=jnp.float32)

    params = prepare_forecasting_params(weight, bias)   # one-time packing
    out = forecasting_layer(context, params)
    jax.block_until_ready(out)
    ref = context @ weight.T + bias
    assert out.shape == (batch, forecast_length)
    assert jnp.allclose(out, ref, atol=1e-5, rtol=1e-5)

    # 2) Tiled path with the K grid axis collapsed (tk == Cp, 2-D grid, no acc).
    B2, C2, F2 = 16, 256, 256
    x2 = jax.random.normal(k_x, (B2, C2), dtype=jnp.float32)
    w2 = jax.random.uniform(k_w, (F2, C2), minval=-0.1, maxval=0.1, dtype=jnp.float32)
    b2 = jax.random.uniform(k_b, (F2,), minval=-0.1, maxval=0.1, dtype=jnp.float32)
    ref2 = x2 @ w2.T + b2

    params2 = prepare_forecasting_params(w2, b2)
    out2 = forecasting_layer(x2, params2, force_tiled=True)
    jax.block_until_ready(out2)
    assert out2.shape == (B2, F2)
    assert jnp.allclose(out2, ref2, atol=1e-4, rtol=1e-4)

    # 3) Accumulator (3-D grid) path, exercised at small shapes by capping the
    #    tiles so K > 1 and N > 1 blocks exist.
    params3 = prepare_forecasting_params(w2, b2, max_tn=128, max_tk=128)
    out3 = forecasting_layer(x2, params3, force_tiled=True)
    jax.block_until_ready(out3)
    assert out3.shape == (B2, F2)
    assert jnp.allclose(out3, ref2, atol=1e-4, rtol=1e-4)

    print("KERNEL_OK")
</pallas_src>

<mosaic_0001>
module attributes {stable_mosaic.version = 11 : i64} {
  func.func @_linear_bias_kernel(%arg0: memref<8x128xf32, #tpu.memory_space<vmem>>, %arg1: memref<128x128xf32, #tpu.memory_space<vmem>>, %arg2: memref<1x128xf32, #tpu.memory_space<vmem>>, %arg3: memref<8x128xf32, #tpu.memory_space<vmem>>) attributes {dimension_semantics = [], scalar_prefetch = 0 : i64, scratch_operands = 0 : i64, tpu.core_type = #tpu.core_type<tc>} {
    %c0 = arith.constant 0 : index
    %c0_0 = arith.constant 0 : index
    %0 = vector.load %arg0[%c0, %c0_0] : memref<8x128xf32, #tpu.memory_space<vmem>>, vector<8x128xf32>
    %c0_1 = arith.constant 0 : index
    %c0_2 = arith.constant 0 : index
    %1 = vector.load %arg1[%c0_1, %c0_2] : memref<128x128xf32, #tpu.memory_space<vmem>>, vector<128x128xf32>
    %cst = arith.constant dense<0.000000e+00> : vector<8x128xf32>
    %2 = tpu.matmul %0, %1, %cst {dimension_numbers = #tpu.dot_dimension_numbers<[1], [0], [0], [1], [0, 0, 1, 1], [], []>} : vector<8x128xf32>, vector<128x128xf32>, vector<8x128xf32> -> vector<8x128xf32>
    %c0_3 = arith.constant 0 : index
    %c0_4 = arith.constant 0 : index
    %3 = vector.load %arg2[%c0_3, %c0_4] : memref<1x128xf32, #tpu.memory_space<vmem>>, vector<1x128xf32>
    %4 = vector.broadcast %3 : vector<1x128xf32> to vector<8x128xf32>
    %5 = arith.addf %2, %4 : vector<8x128xf32>
    %c0_5 = arith.constant 0 : index
    %c0_6 = arith.constant 0 : index
    %6 = vector.load %arg3[%c0_5, %c0_6] : memref<8x128xf32, #tpu.memory_space<vmem>>, vector<8x128xf32>
    tpu.vector_store %arg3[%c0_5, %c0_6], %5 {strides = array<i32>} : memref<8x128xf32, #tpu.memory_space<vmem>>, vector<8x128xf32>,
    return
  }
}

</mosaic_0001>

<bundles_post_ra>
// kernel: tpu_custom_call.1
= control target key start
LH: loop header
LB: loop body
LE: loop exit
PB: predicated region body
PF: predicated region fallthrough
CT: control target
= control target key end

     0   :  { %8 = vsyncpa [#allocation3], 0  ;;  %s383_s0 = inlined_call_operand.hbm [shape: f32[8,128], index: 0, kind: input, shape index: {}]   ;;  %s384_s1 = inlined_call_operand.hbm [shape: f32[128,128], index: 1, kind: input, shape index: {}]   ;;  %s385_s2 = inlined_call_operand.vmem [shape: f32[1,128], index: 2, kind: input, shape index: {}]   ;;  %s386_s3 = inlined_call_operand.hbm [shape: f32[8,128], index: 3, kind: output, shape index: {}]  }
   0x1   :  { %9 = vsyncpa [#allocation6], 0 }
   0x2   :  { %10 = vsyncpa [#allocation4], 0  ;;  %s309_s12 = smov [#allocation2]   ;;  %s310_s14 = smov [#allocation5]  }
   0x3   :  { %s17_s13 = sshll.u32 %s309_s12, 4  ;;  %s26_s15 = sshll.u32 %s310_s14, 4  ;;  %s18_s13 = int_to_ptr.vmem [resolvable:$true] %s17_s13  ;;  %s337_s15 = int_to_ptr.vmem [resolvable:$true] %s26_s15 }
   0x4   :  { %s237_s18 = scalar_lea.hbm %s383_s0, 128 }
   0x5   :  { %p238_p0 = scmp.ne.s32.totalorder %s383_s0, %s237_s18  ;;  %p241_p1 = scmp.lt.u32.totalorder %s237_s18, %s383_s0 }
   0x7   :  { %p243_p2 = pnand %p241_p1, %p238_p0 }
   0x9   :  { %246 = shalt.err (!%p243_p2)
}
   0xa   :  { %s247_s23 = scalar_lea.vmem %s18_s13, 128  ;;  %p252_p4 = scmp.lt.s32.totalorder %s18_s13, %s18_s13 }
   0xb   :  { %p248_p3 = scmp.ne.s32.totalorder %s18_s13, %s247_s23  ;;  %p253_p5 = scmp.lt.s32.totalorder %s247_s23, %s247_s23 }
   0xd   :  { %p254_p6 = por %p253_p5, %p252_p4 }
   0xf   :  { %p255_p7 = pnand %p254_p6, %p248_p3 }
  0x11   :  { %258 = shalt.err (!%p255_p7)
}
  0x12   :  { %20 = dma.hbm_to_vmem [thread:$0]  %s383_s0, 128, %s18_s13, [#allocation3]  }
  0x13   :  { %s259_s28 = scalar_lea.hbm %s384_s1, 2048 }
  0x14   :  { %p260_p8 = scmp.ne.s32.totalorder %s384_s1, %s259_s28  ;;  %p263_p9 = scmp.lt.u32.totalorder %s259_s28, %s384_s1 }
  0x16   :  { %p265_p10 = pnand %p263_p9, %p260_p8 }
  0x18   :  { %268 = shalt.err (!%p265_p10)
}
  0x19   :  { %s269_s6 = scalar_lea.vmem %s337_s15, 2048  ;;  %p274_p12 = scmp.lt.s32.totalorder %s337_s15, %s337_s15 }
  0x1a   :  { %p270_p11 = scmp.ne.s32.totalorder %s337_s15, %s269_s6  ;;  %p275_p13 = scmp.lt.s32.totalorder %s269_s6, %s269_s6 }
  0x1c   :  { %p276_p0 = por %p275_p13, %p274_p12 }
  0x1e   :  { %p277_p1 = pnand %p276_p0, %p270_p11 }
  0x20   :  { %280 = shalt.err (!%p277_p1)
}
  0x21   :  { %s311_s0 = smov 128   ;;  %s312_s7 = smov 8  }
  0x22   :  { %32 = dma.hbm_to_vmem [thread:$0]  %s384_s1, 2048, %s337_s15, [#allocation6], %s311_s0, %s311_s0, %s312_s7  }
  0x23   :  { %303 = dma.done.wait [#allocation3], 128  }
  0x24   :  { %304 = vsyncadd [#allocation3], 4294967168 }
  0x25   :  { %305 = dma.done.wait [#allocation6], 2048  }
  0x26   :  { %306 = vsyncadd [#allocation6], 4294965248  ;;  %v313_v0 = vmov 0.0|0.0   ;;  %vm314_vm0 = vmmov 0   ;;  %v315_v1 = vmov 0.0   ;;  %v42_v2 = vld [vmem:[#allocation5] sm:$0xff] }
  0x27   :  { %205 = vmatprep.subr.bf16.mxu0 %v313_v0  ;;  %202 = vmatprep.mubr.msk.f32.mxu0 %vm314_vm0, %v315_v1  ;;  %v43_v3 = vld [vmem:[#allocation5 + $0x8] sm:$0xff]  ;;  %v44_v4 = vld [vmem:[#allocation5 + $0x10] sm:$0xff]  ;;  %v45_v6 = vld [vmem:[#allocation5 + $0x18] sm:$0xff]  ;;  %s316_s11 = smov [#allocation7]  }
  0x28   :  { %v206_v5 = vpack.c.bf16 %v43_v3, %v42_v2  ;;  %v209_v7 = vpack.c.bf16 %v45_v6, %v44_v4  ;;  %v46_v8 = vld [vmem:[#allocation5 + $0x20] sm:$0xff]  ;;  %v47_v9 = vld [vmem:[#allocation5 + $0x28] sm:$0xff]  ;;  %v48_v11 = vld [vmem:[#allocation5 + $0x30] sm:$0xff]  ;;  %s142_s12 = sshll.u32 %s316_s11, 4  ;;  %s143_s12 = int_to_ptr.vmem [resolvable:$true] %s142_s12 }
  0x29   :  { %v212_v10 = vpack.c.bf16 %v47_v9, %v46_v8  ;;  %v49_v12 = vld [vmem:[#allocation5 + $0x38] sm:$0xff]  ;;  %v50_v14 = vld [vmem:[#allocation5 + $0x40] sm:$0xff]  ;;  %v51_v15 = vld [vmem:[#allocation5 + $0x48] sm:$0xff]  ;;  %s281_s13 = scalar_lea.vmem %s143_s12, 128  ;;  %p286_p3 = scmp.lt.s32.totalorder %s143_s12, %s143_s12 }
  0x2a   :  { %207 = vmatpush3.bf16.msra.mxu0 %v206_v5  ;;  %v215_v13 = vpack.c.bf16 %v49_v12, %v48_v11  ;;  %v218_v16 = vpack.c.bf16 %v51_v15, %v50_v14  ;;  %v52_v17 = vld [vmem:[#allocation5 + $0x50] sm:$0xff]  ;;  %v53_v18 = vld [vmem:[#allocation5 + $0x58] sm:$0xff]  ;;  %v54_v20 = vld [vmem:[#allocation5 + $0x60] sm:$0xff]  ;;  %p282_p2 = scmp.ne.s32.totalorder %s143_s12, %s281_s13  ;;  %p287_p4 = scmp.lt.s32.totalorder %s281_s13, %s281_s13 }
  0x2b   :  { %208 = vmatprep.subr.bf16.mxu0 %v313_v0  ;;  %v221_v19 = vpack.c.bf16 %v53_v18, %v52_v17  ;;  %v55_v21 = vld [vmem:[#allocation5 + $0x68] sm:$0xff]  ;;  %v56_v23 = vld [vmem:[#allocation5 + $0x70] sm:$0xff]  ;;  %v57_v24 = vld [vmem:[#allocation5 + $0x78] sm:$0xff] }
  0x2c   :  { %v224_v22 = vpack.c.bf16 %v55_v21, %v54_v20  ;;  %v227_v25 = vpack.c.bf16 %v57_v24, %v56_v23  ;;  %v41_v26 = vld [vmem:[#allocation2] sm:$0xff]  ;;  %p288_p5 = por %p287_p4, %p286_p3 }
  0x2d   :  { %v152_v27 = vld [vmem:[%s385_s2] ss:$0 sm:$0xff] }
  0x2e   :  { %210 = vmatpush3.bf16.msra.mxu0 %v209_v7  ;;  %p289_p6 = pnand %p288_p5, %p282_p2 }
  0x2f   :  { %211 = vmatprep.subr.bf16.mxu0 %v313_v0 }
  0x32   :  { %213 = vmatpush3.bf16.msra.mxu0 %v212_v10 }
  0x33   :  { %214 = vmatprep.subr.bf16.mxu0 %v313_v0 }
  0x36   :  { %216 = vmatpush3.bf16.msra.mxu0 %v215_v13 }
  0x37   :  { %217 = vmatprep.subr.bf16.mxu0 %v313_v0 }
  0x3a   :  { %219 = vmatpush3.bf16.msra.mxu0 %v218_v16 }
  0x3b   :  { %220 = vmatprep.subr.bf16.mxu0 %v313_v0 }
  0x3e   :  { %222 = vmatpush3.bf16.msra.mxu0 %v221_v19 }
  0x3f   :  { %223 = vmatprep.subr.bf16.mxu0 %v313_v0 }
  0x42   :  { %225 = vmatpush3.bf16.msra.mxu0 %v224_v22 }
  0x43   :  { %226 = vmatprep.subr.bf16.mxu0 %v313_v0 }
  0x46   :  { %228 = vmatpush3.bf16.msra.mxu0 %v227_v25 }
  0x49   :  { %203 = vmatmul.mubr.f32.vlgmr.msra.gmra.mrb[0].mxu0 %v41_v26 }
 0x11c   :  { %v131_v28 = vpop.f32.mrb[0].mxu0 }
 0x11d   :  { %v132_v29 = vadd.f32 %v152_v27, %v131_v28  ;;  %v204_v30 = vpop.f32.mrb[1].mxu0 }
 0x11f   :  { %135 = vst [vmem:[#allocation7] sm:$0xff] %v132_v29 }
 0x120   :  { %292 = shalt.err (!%p289_p6)
}
 0x121   :  { %s293_s16 = scalar_lea.hbm %s386_s3, 128 }
 0x122   :  { %p294_p7 = scmp.ne.s32.totalorder %s386_s3, %s293_s16  ;;  %p297_p8 = scmp.lt.u32.totalorder %s293_s16, %s386_s3 }
 0x124   :  { %p299_p9 = pnand %p297_p8, %p294_p7 }
 0x126   :  { %302 = shalt.err (!%p299_p9)
}
 0x127   :  { %145 = dma.vmem_to_hbm [thread:$0]  %s143_s12, 128, %s386_s3, [#allocation4]  }
 0x128   :  { %307 = dma.done.wait [#allocation4], 128  }
 0x129   :  { %308 = vsyncadd [#allocation4], 4294967168 }
 0x12a   :  { %149 = vsyncpa [#allocation3], 1 }
 0x12b   :  { %150 = vsyncpa [#allocation6], 1 }
 0x12c   :  { %151 = vsyncpa [#allocation4], 1 }

</bundles_post_ra>
